<compile_context>
chip_gen: v7x
topology: tpu7x:2x2x1
jax: 0.10.0
libtpu: 0.0.40
codegen_flags: <defaults>
</compile_context>

<pallas_src>
import math

import jax
import jax.numpy as jnp
from jax.experimental import pallas as pl
from jax.experimental.pallas import tpu as pltpu


def make_temporal_pe(max_len, d_model, dtype=jnp.float32):
    """Replicates the PyTorch __init__ PE table exactly:
       pe[pos, i]   = sin(pos / 10000 ** (2 * i       / d_model))  (even i)
       pe[pos, i+1] = cos(pos / 10000 ** (2 * (i + 1) / d_model))
    """
    assert d_model % 2 == 0, "d_model must be even (matches PyTorch loop)"
    pos = jnp.arange(max_len, dtype=jnp.float32)[:, None]            # (L, 1)
    i_even = jnp.arange(0, d_model, 2, dtype=jnp.float32)[None, :]   # (1, D/2)
    div_even = jnp.power(10000.0, 2.0 * i_even / d_model)
    div_odd = jnp.power(10000.0, 2.0 * (i_even + 1.0) / d_model)
    pe_even = jnp.sin(pos / div_even)                                # (L, D/2)
    pe_odd = jnp.cos(pos / div_odd)                                  # (L, D/2)
    # interleave: columns [0,1,2,...] = [sin, cos, sin, cos, ...]
    pe = jnp.stack([pe_even, pe_odd], axis=-1).reshape(max_len, d_model)
    return pe.astype(dtype)


def _tpe_add_kernel(x_ref, pe_ref, o_ref):
    # x_ref:  (TB, C)  rows are (batch, node) slices; columns lane-dense
    # pe_ref: (1,  C)  positional-encoding slab (native dtype, cast in-kernel)
    # o_ref:  (TB, C)
    o_ref[...] = x_ref[...] + pe_ref[...].astype(x_ref.dtype)


def _num_tensorcores():
    """Best-effort TensorCores-per-chip query (2 on v7x, 1 on v5e/v6e)."""
    try:
        info = pltpu.get_tpu_info()
        for attr in ("num_cores", "num_tensorcores", "tensorcore_count",
                     "cores_per_chip", "num_cores_per_chip"):
            v = getattr(info, attr, None)
            if isinstance(v, int) and 0 < v <= 8:
                return v
    except Exception:
        pass
    try:
        kind = jax.devices()[0].device_kind.lower()
        if "v7" in kind:
            return 2
    except Exception:
        pass
    return 1


def _pick_block_rows(rows, cols, itemsize, num_cores):
    """Row-block size for the (rows, cols) slab.

    Rules (perf review):
      - aligned to the dtype's sublane packing (8 f32 / 16 bf16 / 32 int8),
      - per-tile ~<= 1 MiB (roofline plateau; bigger buys nothing),
      - in+out, double-buffered (4 tile buffers) kept within ~8 MiB VMEM
        (conservative for v7x's 64 MiB VMEM as well as v5e/v6e),
      - >= ~4 grid steps per TensorCore when the problem is big enough so the
        software pipeline actually overlaps fetch/compute/writeback,
      - tiny problems -> single block / single grid step (no pipeline to feed).
    The caller builds the grid with pl.cdiv, so no divisibility of `rows` is
    required; the ragged last block is handled by Pallas.
    """
    align = 8 if itemsize >= 4 else (16 if itemsize == 2 else 32)
    row_bytes = cols * itemsize

    # Tiny problem: one grid step (block dims == array dims is always legal).
    if rows * row_bytes <= (1 << 20) or rows <= align:
        return rows

    by_target = (1 << 20) // row_bytes            # ~1 MiB tile target
    by_vmem = (8 << 20) // (4 * row_bytes)        # 4 double-buffered tiles
    block = max(align, min(by_target, by_vmem))

    # Keep >= ~4 pipelined steps per TensorCore (>= 8 total on 2-TC chips).
    min_steps = 4 * max(1, num_cores)
    block = min(block, max(align, pl.cdiv(rows, min_steps)))

    block = max(align, (block // align) * align)  # sublane alignment
    return min(block, rows)


def temporal_positional_encoding(x, pe, lookup_index=None, dropout_p=0.0):
    """
    x:  (B, N, T, F)   input
    pe: (max_len, F)   positional-encoding table (make_temporal_pe)
    returns (B, N, T, F)
    """
    # TODO(synk): train-mode dropout (p > 0) would need in-kernel
    # pltpu.prng_seed + stateful_bernoulli; this forward matches eval / p==0.
    del dropout_p

    B, N, T, F = x.shape
    if lookup_index is not None:
        pe_t = jnp.take(pe, jnp.asarray(lookup_index), axis=0)  # (T, F)
    else:
        pe_t = pe[:T]                                            # (T, F)

    rows, cols = B * N, T * F
    x2 = x.reshape(rows, cols)       # contiguous dims -> free reshape
    pe2 = pe_t.reshape(1, cols)      # native dtype; cast happens in-kernel

    # Lane-density guard: pad the collapsed last dim up to a multiple of 128
    # so output stores are unmasked vst.
    pad = (-cols) % 128
    if pad:
        # TODO(synk): padding costs one extra copy of x; prefer keeping T*F a
        # multiple of 128 upstream, or fusing this add into the next kernel.
        x2 = jnp.pad(x2, ((0, 0), (0, pad)))
        pe2 = jnp.pad(pe2, ((0, 0), (0, pad)))
    cols_p = cols + pad

    block_rows = _pick_block_rows(rows, cols_p, jnp.dtype(x.dtype).itemsize,
                                  _num_tensorcores())
    grid = (pl.cdiv(rows, block_rows),)   # ragged last block handled by Pallas

    out2 = pl.pallas_call(
        _tpe_add_kernel,
        out_shape=jax.ShapeDtypeStruct((rows, cols_p), x.dtype),
        grid_spec=pltpu.PrefetchScalarGridSpec(
            num_scalar_prefetch=0,
            grid=grid,
            in_specs=[
                pl.BlockSpec((block_rows, cols_p), lambda i: (i, 0)),
                pl.BlockSpec((1, cols_p), lambda i: (0, 0)),  # VMEM-resident PE
            ],
            out_specs=pl.BlockSpec((block_rows, cols_p), lambda i: (i, 0)),
        ),
        compiler_params=pltpu.CompilerParams(
            dimension_semantics=("parallel",),
            vmem_limit_bytes=32 << 20,   # safe on v5e/v6e/v7x; tiles <= ~1 MiB
        ),
        input_output_aliases={0: 0},     # reuse x2's HBM buffer for the output
    )(x2, pe2)

    if pad:
        out2 = out2[:, :cols]
    out = out2.reshape(B, N, T, F)
    # PyTorch returns dropout(x.detach()): block gradients through this op.
    return jax.lax.stop_gradient(out)


def _reference(x, pe, lookup_index=None):
    """Pure-JAX mirror of the PyTorch forward (dropout p=0 -> identity)."""
    B, N, T, F = x.shape
    if lookup_index is not None:
        pe_t = jnp.take(pe, jnp.asarray(lookup_index), axis=0)
    else:
        pe_t = pe[:T]
    return x + pe_t[None, None, :, :].astype(x.dtype)


if __name__ == "__main__":
    # (batch=2, spatial N=16, seq T=8, hidden F=32), as the forward implies.
    B, N, T, F = 2, 16, 8, 32
    max_len = 12
    dropout_p = 0.0

    key = jax.random.PRNGKey(0)
    x = jax.random.normal(key, (B, N, T, F), dtype=jnp.float32)

    pe = make_temporal_pe(max_len, F)

    # References computed up-front (kernel never mutates caller arrays, but
    # keep the check independent of buffer-aliasing behaviour).
    ref1 = _reference(x, pe, None)
    lookup = jnp.array([3, 1, 0, 7, 2, 5, 4, 6], dtype=jnp.int32)
    ref2 = _reference(x, pe, lookup)

    # default path: pe[:, :, :T, :]
    out1 = jax.block_until_ready(
        temporal_positional_encoding(x, pe, lookup_index=None,
                                     dropout_p=dropout_p))
    assert out1.shape == (B, N, T, F), out1.shape
    assert jnp.allclose(out1, ref1, atol=1e-6, rtol=1e-6), "mismatch (no lookup)"

    # lookup_index path: pe[:, :, lookup_index, :]
    out2 = jax.block_until_ready(
        temporal_positional_encoding(x, pe, lookup_index=lookup,
                                     dropout_p=dropout_p))
    assert jnp.allclose(out2, ref2, atol=1e-6, rtol=1e-6), "mismatch (lookup)"

    print("KERNEL_OK")
</pallas_src>

<mosaic_0001>
module attributes {stable_mosaic.version = 11 : i64} {
  func.func @_tpe_add_kernel(%arg0: i32, %arg1: memref<32x256xf32, #tpu.memory_space<vmem>>, %arg2: memref<1x256xf32, #tpu.memory_space<vmem>>, %arg3: memref<32x256xf32, #tpu.memory_space<vmem>>) attributes {dimension_semantics = [#tpu.dimension_semantics<parallel>], iteration_bounds = array<i64: 1>, scalar_prefetch = 0 : i64, scratch_operands = 0 : i64, tpu.core_type = #tpu.core_type<tc>, window_params = [{transform_indices = @transform_0, window_bounds = array<i64: 32, 256>}, {pipeline_mode = #tpu.pipeline_mode<synchronous>, transform_indices = @transform_1, window_bounds = array<i64: 1, 256>}, {transform_indices = @transform_2, window_bounds = array<i64: 32, 256>}]} {
    %c0 = arith.constant 0 : index
    %c0_0 = arith.constant 0 : index
    %0 = vector.load %arg1[%c0, %c0_0] : memref<32x256xf32, #tpu.memory_space<vmem>>, vector<32x256xf32>
    %c0_1 = arith.constant 0 : index
    %c0_2 = arith.constant 0 : index
    %1 = vector.load %arg2[%c0_1, %c0_2] : memref<1x256xf32, #tpu.memory_space<vmem>>, vector<1x256xf32>
    %2 = vector.broadcast %1 : vector<1x256xf32> to vector<32x256xf32>
    %3 = arith.addf %0, %2 : vector<32x256xf32>
    %c0_3 = arith.constant 0 : index
    %c0_4 = arith.constant 0 : index
    %4 = vector.load %arg3[%c0_3, %c0_4] : memref<32x256xf32, #tpu.memory_space<vmem>>, vector<32x256xf32>
    tpu.vector_store %arg3[%c0_3, %c0_4], %3 {strides = array<i32>} : memref<32x256xf32, #tpu.memory_space<vmem>>, vector<32x256xf32>,
    return
  }
  func.func @transform_0(%arg0: i32) -> (i32, i32) {
    %c0_i32 = arith.constant 0 : i32
    %c0_i32_0 = arith.constant 0 : i32
    return %arg0, %c0_i32 : i32, i32
  }
  func.func @transform_1(%arg0: i32) -> (i32, i32) {
    %c0_i32 = arith.constant 0 : i32
    %c0_i32_0 = arith.constant 0 : i32
    %c0_i32_1 = arith.constant 0 : i32
    return %c0_i32, %c0_i32_0 : i32, i32
  }
  func.func @transform_2(%arg0: i32) -> (i32, i32) {
    %c0_i32 = arith.constant 0 : i32
    %c0_i32_0 = arith.constant 0 : i32
    return %arg0, %c0_i32 : i32, i32
  }
}

</mosaic_0001>

<bundles_post_ra>
// kernel: tpu_custom_call.1
= control target key start
LH: loop header
LB: loop body
LE: loop exit
PB: predicated region body
PF: predicated region fallthrough
CT: control target
= control target key end

     0   :  { %7 = vsyncpa [#allocation3], 0  ;;  %s183_s0 = inlined_call_operand.hbm [shape: f32[32,256], index: 0, kind: input, shape index: {}, may-alias: {0,2}]   ;;  %s184_s1 = inlined_call_operand.vmem [shape: f32[1,256], index: 1, kind: input, shape index: {}]   ;;  %s185_s2 = inlined_call_operand.hbm [shape: f32[32,256], index: 2, kind: output, shape index: {}, may-alias: {0,2}]  }
   0x1   :  { %8 = vsyncpa [#allocation4], 0  ;;  %s131_s9 = smov [#allocation2]   ;;  %s83_s13 = scalar_lea.hbm %s183_s0, 1024 }
   0x2   :  { %s14_s10 = sshll.u32 %s131_s9, 4  ;;  %p84_p0 = scmp.ne.s32.totalorder %s183_s0, %s83_s13  ;;  %s15_s10 = int_to_ptr.vmem [resolvable:$true] %s14_s10 }
   0x3   :  { %p87_p1 = scmp.lt.u32.totalorder %s83_s13, %s183_s0 }
   0x5   :  { %p89_p2 = pnand %p87_p1, %p84_p0 }
   0x7   :  { %92 = shalt.err (!%p89_p2)
}
   0x8   :  { %s93_s18 = scalar_lea.vmem %s15_s10, 1024  ;;  %p98_p4 = scmp.lt.s32.totalorder %s15_s10, %s15_s10 }
   0x9   :  { %p94_p3 = scmp.ne.s32.totalorder %s15_s10, %s93_s18  ;;  %p99_p5 = scmp.lt.s32.totalorder %s93_s18, %s93_s18 }
   0xb   :  { %p100_p6 = por %p99_p5, %p98_p4 }
   0xd   :  { %p101_p7 = pnand %p100_p6, %p94_p3 }
   0xf   :  { %104 = shalt.err (!%p101_p7)
}
  0x10   :  { %s132_s19 = smov 256   ;;  %s133_s20 = smov 16  }
  0x11   :  { %20 = dma.hbm_to_vmem [thread:$0]  %s183_s0, 1024, %s15_s10, [#allocation3], %s132_s19, %s132_s19, %s133_s20  }
  0x12   :  { %127 = dma.done.wait [#allocation3], 1024  }
  0x13   :  { %128 = vsyncadd [#allocation3], 4294966272  ;;  %v36_v0 = vlaneseq  ;;  %v26_v4 = vld [vmem:[#allocation2] sm:$0xff]  ;;  %v27_v6 = vld [vmem:[#allocation2 + $0x8] sm:$0xff]  ;;  %s134_s25 = smov [#allocation5]  }
  0x14   :  { %v34_v5 = vld [vmem:[%s184_s1] sm:$0x3]  ;;  %v28_v9 = vld [vmem:[#allocation2 + $0x10] sm:$0xff]  ;;  %v29_v10 = vld [vmem:[#allocation2 + $0x18] sm:$0xff]  ;;  %s67_s26 = sshll.u32 %s134_s25, 4  ;;  %s68_s26 = int_to_ptr.vmem [resolvable:$true] %s67_s26 }
  0x15   :  { %v37_v1 = vshrl.u32 %v36_v0, 7  ;;  %v30_v11 = vld [vmem:[#allocation2 + $0x20] sm:$0xff]  ;;  %v31_v12 = vld [vmem:[#allocation2 + $0x28] sm:$0xff]  ;;  %v32_v13 = vld [vmem:[#allocation2 + $0x30] sm:$0xff]  ;;  %s105_s0 = scalar_lea.vmem %s68_s26, 1024  ;;  %p110_p9 = scmp.lt.s32.totalorder %s68_s26, %s68_s26 }
  0x16   :  { %v33_v14 = vld [vmem:[#allocation2 + $0x38] sm:$0xff]  ;;  %p106_p8 = scmp.ne.s32.totalorder %s68_s26, %s105_s0  ;;  %p111_p10 = scmp.lt.s32.totalorder %s105_s0, %s105_s0 }
  0x17   :  { %v38_v2 = vsub.s32 0, %v37_v1  ;;  %v42_v3 = vsub.s32 1, %v37_v1 }
  0x18   :  { %p112_p11 = por %p111_p10, %p110_p9 }
  0x19   :  { %v39_v7 = vrot.slane %v34_v5, %v38_v2  ;;  %v43_v8 = vrot.slane %v34_v5, %v42_v3 }
  0x1a   :  { %p113_p12 = pnand %p112_p11, %p106_p8 }
  0x1b   :  { %v46_v15 = vadd.f32 %v39_v7, %v26_v4  ;;  %v47_v16 = vadd.f32 %v43_v8, %v27_v6  ;;  %v48_v17 = vadd.f32 %v39_v7, %v28_v9  ;;  %v49_v18 = vadd.f32 %v43_v8, %v29_v10 }
  0x1c   :  { %v50_v19 = vadd.f32 %v39_v7, %v30_v11  ;;  %v51_v20 = vadd.f32 %v43_v8, %v31_v12  ;;  %v52_v21 = vadd.f32 %v39_v7, %v32_v13  ;;  %v53_v22 = vadd.f32 %v43_v8, %v33_v14 }
  0x1d   :  { %54 = vst [vmem:[#allocation5] sm:$0xff] %v46_v15  ;;  %55 = vst [vmem:[#allocation5 + $0x8] sm:$0xff] %v47_v16 }
  0x1e   :  { %56 = vst [vmem:[#allocation5 + $0x10] sm:$0xff] %v48_v17  ;;  %57 = vst [vmem:[#allocation5 + $0x18] sm:$0xff] %v49_v18 }
  0x1f   :  { %58 = vst [vmem:[#allocation5 + $0x20] sm:$0xff] %v50_v19  ;;  %59 = vst [vmem:[#allocation5 + $0x28] sm:$0xff] %v51_v20 }
  0x20   :  { %60 = vst [vmem:[#allocation5 + $0x30] sm:$0xff] %v52_v21  ;;  %61 = vst [vmem:[#allocation5 + $0x38] sm:$0xff] %v53_v22 }
  0x21   :  { %116 = shalt.err (!%p113_p12)
}
  0x22   :  { %s117_s28 = scalar_lea.hbm %s185_s2, 1024 }
  0x23   :  { %p118_p13 = scmp.ne.s32.totalorder %s185_s2, %s117_s28  ;;  %p121_p0 = scmp.lt.u32.totalorder %s117_s28, %s185_s2 }
  0x25   :  { %p123_p1 = pnand %p121_p0, %p118_p13 }
  0x27   :  { %126 = shalt.err (!%p123_p1)
}
  0x28   :  { %73 = dma.vmem_to_hbm [thread:$0]  %s68_s26, 1024, %s185_s2, [#allocation4], %s132_s19, %s132_s19, %s133_s20  }
  0x29   :  { %129 = dma.done.wait [#allocation4], 1024  }
  0x2a   :  { %130 = vsyncadd [#allocation4], 4294966272 }
  0x2b   :  { %77 = vsyncpa [#allocation3], 1 }
  0x2c   :  { %78 = vsyncpa [#allocation4], 1 }

</bundles_post_ra>
